<compile_context>
chip_gen: v6e
topology: v6e:2x2x1
jax: 0.10.0
libtpu: 0.0.40
codegen_flags: <defaults>
</compile_context>

<pallas_src>
import jax
import jax.numpy as jnp
from jax.experimental import pallas as pl
from jax.experimental.pallas import tpu as pltpu


def mlp_kernel(x_ref, w1_ref, b1_ref, w2_ref, b2_ref, o_ref):
    # Layer 1 on the MXU: (TB, Dp) @ (Dp, Hp), f32 accumulation.
    h = jnp.dot(x_ref[...], w1_ref[...], preferred_element_type=jnp.float32)
    h = h + b1_ref[...]

    # ELU (alpha=1).  Negative branch = expm1(h) computed stably as
    # 2*t / (1 - t) with t = tanh(h/2): no catastrophic cancellation for
    # small |h|, and tanh routes to the EUP (free VLIW slot).
    t = jnp.tanh(0.5 * h)
    h = jnp.where(h > 0.0, h, (2.0 * t) / (1.0 - t))

    # Layer 2 output width is 1: broadcast-multiply by the w2 row and reduce
    # across the lane axis (VPU + XLU) instead of an N=1 MXU matmul.
    z = jnp.sum(h * w2_ref[...], axis=-1, keepdims=True) + b2_ref[0, 0]

    # Sigmoid via one EUP tanh: sigmoid(z) = 0.5 * (tanh(z/2) + 1).
    o_ref[...] = 0.5 * (jnp.tanh(0.5 * z) + 1.0)


def _round_up(n, m):
    return ((n + m - 1) // m) * m


def mlp_forward(x, w1, b1, w2, b2, *, block_b=512):
    """Fused MLP forward.

    x: (B, D) f32, w1: (D, H), b1: (1, H) or (H,), w2: (H, 1), b2: scalar-like.
    Returns (B, 1) f32 == sigmoid(elu(x @ w1 + b1) @ w2 + b2).
    """
    x = jnp.asarray(x, jnp.float32)
    B, D = x.shape
    H = w1.shape[1]

    # Lane-align the contraction / hidden dims; sublane-align the batch tile.
    d_pad = _round_up(D, 128)
    h_pad = _round_up(H, 128)
    tb = min(block_b, _round_up(B, 8))
    b_pad = _round_up(B, tb)
    grid = b_pad // tb

    x_p = jnp.zeros((b_pad, d_pad), jnp.float32).at[:B, :D].set(x)
    w1_p = jnp.zeros((d_pad, h_pad), jnp.float32).at[:D, :H].set(
        jnp.asarray(w1, jnp.float32))
    b1_p = jnp.zeros((1, h_pad), jnp.float32).at[:, :H].set(
        jnp.asarray(b1, jnp.float32).reshape(1, H))
    # w2 is (H, 1); store it as a lane-major row so the kernel can do a
    # broadcast-multiply + lane reduction.
    w2_row = jnp.zeros((1, h_pad), jnp.float32).at[:, :H].set(
        jnp.asarray(w2, jnp.float32).reshape(1, H))
    b2_s = jnp.asarray(b2, jnp.float32).reshape(1, 1)

    out_padded = pl.pallas_call(
        mlp_kernel,
        out_shape=jax.ShapeDtypeStruct((b_pad, 1), jnp.float32),
        grid_spec=pltpu.PrefetchScalarGridSpec(
            num_scalar_prefetch=0,
            grid=(grid,),
            in_specs=[
                # x: streamed per batch tile (double-buffered by Pallas).
                pl.BlockSpec((tb, d_pad), lambda i: (i, 0)),
                # Weights / bias1: constant index_map -> VMEM-resident.
                pl.BlockSpec((d_pad, h_pad), lambda i: (0, 0)),
                pl.BlockSpec((1, h_pad), lambda i: (0, 0)),
                pl.BlockSpec((1, h_pad), lambda i: (0, 0)),
                # b2: scalar in SMEM (no padded VMEM tile, no DMA stream).
                pl.BlockSpec(memory_space=pltpu.MemorySpace.SMEM),
            ],
            out_specs=pl.BlockSpec((tb, 1), lambda i: (i, 0)),
        ),
        compiler_params=pltpu.CompilerParams(
            # Independent batch tiles -> shard across TensorCores on v7x.
            dimension_semantics=("parallel",),
        ),
    )(x_p, w1_p, b1_p, w2_row, b2_s)

    return out_padded[:B]


def init_params(key, dim, hidden_dim=32):
    # Deterministic init mimicking PyTorch nn.Linear defaults:
    # U(-1/sqrt(fan_in), 1/sqrt(fan_in)) for weights and biases.
    k1, k2, k3, k4 = jax.random.split(key, 4)
    bound1 = 1.0 / jnp.sqrt(dim)
    bound2 = 1.0 / jnp.sqrt(hidden_dim)
    w1 = jax.random.uniform(k1, (dim, hidden_dim), jnp.float32, -bound1, bound1)
    b1 = jax.random.uniform(k2, (1, hidden_dim), jnp.float32, -bound1, bound1)
    w2 = jax.random.uniform(k3, (hidden_dim, 1), jnp.float32, -bound2, bound2)
    b2 = jax.random.uniform(k4, (1, 1), jnp.float32, -bound2, bound2)
    return w1, b1, w2, b2


def reference_forward(x, w1, b1, w2, b2):
    h = x @ w1 + b1
    h = jnp.where(h > 0, h, jnp.expm1(h))      # torch.nn.ELU (alpha=1)
    z = h @ w2 + b2
    return jax.nn.sigmoid(z)                   # torch.nn.Sigmoid


# TODO(synk): MLP.fit / torch.optimize.AdamOptimizer training loop is not
# translated — this implements the forward pass only.

if __name__ == "__main__":
    batch, dim, hidden = 8, 16, 32
    key = jax.random.PRNGKey(0)
    kx, kp = jax.random.split(key)
    x = jax.random.normal(kx, (batch, dim), jnp.float32)
    w1, b1, w2, b2 = init_params(kp, dim, hidden)

    out = mlp_forward(x, w1, b1, w2, b2)
    out = jax.block_until_ready(out)

    ref = reference_forward(x, w1, b1, w2, b2)
    assert out.shape == (batch, 1)
    assert jnp.allclose(out, ref, atol=1e-5, rtol=1e-5), float(
        jnp.max(jnp.abs(out - ref)))

    print("KERNEL_OK")
</pallas_src>

<mosaic_0001>
module attributes {stable_mosaic.version = 11 : i64} {
  func.func @mlp_kernel(%arg0: i32, %arg1: memref<8x128xf32, #tpu.memory_space<vmem>>, %arg2: memref<128x128xf32, #tpu.memory_space<vmem>>, %arg3: memref<1x128xf32, #tpu.memory_space<vmem>>, %arg4: memref<1x128xf32, #tpu.memory_space<vmem>>, %arg5: memref<1x1xf32, #tpu.memory_space<smem>>, %arg6: memref<8x1xf32, #tpu.memory_space<vmem>>) attributes {dimension_semantics = [#tpu.dimension_semantics<parallel>], iteration_bounds = array<i64: 1>, scalar_prefetch = 0 : i64, scratch_operands = 0 : i64, tpu.core_type = #tpu.core_type<tc>, window_params = [{transform_indices = @transform_0, window_bounds = array<i64: 8, 128>}, {pipeline_mode = #tpu.pipeline_mode<synchronous>, transform_indices = @transform_1, window_bounds = array<i64: 128, 128>}, {pipeline_mode = #tpu.pipeline_mode<synchronous>, transform_indices = @transform_2, window_bounds = array<i64: 1, 128>}, {pipeline_mode = #tpu.pipeline_mode<synchronous>, transform_indices = @transform_3, window_bounds = array<i64: 1, 128>}, {transform_indices = @transform_4, window_bounds = array<i64: 1, 1>}, {transform_indices = @transform_5, window_bounds = array<i64: 8, 1>}]} {
    %c0 = arith.constant 0 : index
    %c0_0 = arith.constant 0 : index
    %0 = vector.load %arg1[%c0, %c0_0] : memref<8x128xf32, #tpu.memory_space<vmem>>, vector<8x128xf32>
    %c0_1 = arith.constant 0 : index
    %c0_2 = arith.constant 0 : index
    %1 = vector.load %arg2[%c0_1, %c0_2] : memref<128x128xf32, #tpu.memory_space<vmem>>, vector<128x128xf32>
    %cst = arith.constant dense<0.000000e+00> : vector<8x128xf32>
    %2 = tpu.matmul %0, %1, %cst {dimension_numbers = #tpu.dot_dimension_numbers<[1], [0], [0], [1], [0, 0, 1, 1], [], []>} : vector<8x128xf32>, vector<128x128xf32>, vector<8x128xf32> -> vector<8x128xf32>
    %c0_3 = arith.constant 0 : index
    %c0_4 = arith.constant 0 : index
    %3 = vector.load %arg3[%c0_3, %c0_4] : memref<1x128xf32, #tpu.memory_space<vmem>>, vector<1x128xf32>
    %4 = vector.broadcast %3 : vector<1x128xf32> to vector<8x128xf32>
    %5 = arith.addf %2, %4 : vector<8x128xf32>
    %cst_5 = arith.constant 5.000000e-01 : f32
    %6 = vector.broadcast %cst_5 : f32 to vector<8x128xf32>
    %7 = arith.mulf %6, %5 : vector<8x128xf32>
    %8 = math.tanh %7 : vector<8x128xf32>
    %cst_6 = arith.constant 0.000000e+00 : f32
    %9 = vector.broadcast %cst_6 : f32 to vector<8x128xf32>
    %10 = arith.cmpf ogt, %5, %9 : vector<8x128xf32>
    %cst_7 = arith.constant 2.000000e+00 : f32
    %11 = vector.broadcast %cst_7 : f32 to vector<8x128xf32>
    %12 = arith.mulf %11, %8 : vector<8x128xf32>
    %cst_8 = arith.constant 1.000000e+00 : f32
    %13 = vector.broadcast %cst_8 : f32 to vector<8x128xf32>
    %14 = arith.subf %13, %8 : vector<8x128xf32>
    %15 = arith.divf %12, %14 : vector<8x128xf32>
    %16 = arith.select %10, %5, %15 : vector<8x128xi1>, vector<8x128xf32>
    %c0_9 = arith.constant 0 : index
    %c0_10 = arith.constant 0 : index
    %17 = vector.load %arg4[%c0_9, %c0_10] : memref<1x128xf32, #tpu.memory_space<vmem>>, vector<1x128xf32>
    %18 = vector.broadcast %17 : vector<1x128xf32> to vector<8x128xf32>
    %19 = arith.mulf %16, %18 : vector<8x128xf32>
    %cst_11 = arith.constant dense<0.000000e+00> : vector<8xf32>
    %20 = vector.multi_reduction <add>, %19, %cst_11 [1] : vector<8x128xf32> to vector<8xf32>
    %21 = vector.shape_cast %20 : vector<8xf32> to vector<8x1xf32>
    %c0_12 = arith.constant 0 : index
    %c0_13 = arith.constant 0 : index
    %22 = memref.load %arg5[%c0_12, %c0_13] : memref<1x1xf32, #tpu.memory_space<smem>>
    %23 = vector.broadcast %22 : f32 to vector<8x1xf32>
    %24 = arith.addf %21, %23 : vector<8x1xf32>
    %cst_14 = arith.constant 5.000000e-01 : f32
    %25 = vector.broadcast %cst_14 : f32 to vector<8x1xf32>
    %26 = arith.mulf %25, %24 : vector<8x1xf32>
    %27 = math.tanh %26 : vector<8x1xf32>
    %cst_15 = arith.constant 1.000000e+00 : f32
    %28 = vector.broadcast %cst_15 : f32 to vector<8x1xf32>
    %29 = arith.addf %27, %28 : vector<8x1xf32>
    %cst_16 = arith.constant 5.000000e-01 : f32
    %30 = vector.broadcast %cst_16 : f32 to vector<8x1xf32>
    %31 = arith.mulf %30, %29 : vector<8x1xf32>
    %c0_17 = arith.constant 0 : index
    %c0_18 = arith.constant 0 : index
    %32 = vector.load %arg6[%c0_17, %c0_18] : memref<8x1xf32, #tpu.memory_space<vmem>>, vector<8x1xf32>
    tpu.vector_store %arg6[%c0_17, %c0_18], %31 {strides = array<i32>} : memref<8x1xf32, #tpu.memory_space<vmem>>, vector<8x1xf32>,
    return
  }
  func.func @transform_0(%arg0: i32) -> (i32, i32) {
    %c0_i32 = arith.constant 0 : i32
    %c0_i32_0 = arith.constant 0 : i32
    return %arg0, %c0_i32 : i32, i32
  }
  func.func @transform_1(%arg0: i32) -> (i32, i32) {
    %c0_i32 = arith.constant 0 : i32
    %c0_i32_0 = arith.constant 0 : i32
    %c0_i32_1 = arith.constant 0 : i32
    return %c0_i32, %c0_i32_0 : i32, i32
  }
  func.func @transform_2(%arg0: i32) -> (i32, i32) {
    %c0_i32 = arith.constant 0 : i32
    %c0_i32_0 = arith.constant 0 : i32
    %c0_i32_1 = arith.constant 0 : i32
    return %c0_i32, %c0_i32_0 : i32, i32
  }
  func.func @transform_3(%arg0: i32) -> (i32, i32) {
    %c0_i32 = arith.constant 0 : i32
    %c0_i32_0 = arith.constant 0 : i32
    %c0_i32_1 = arith.constant 0 : i32
    return %c0_i32, %c0_i32_0 : i32, i32
  }
  func.func @transform_4(%arg0: i32) -> (i32, i32) {
    %c0_i32 = arith.constant 0 : i32
    %c0_i32_0 = arith.constant 0 : i32
    %c0_i32_1 = arith.constant 0 : i32
    return %c0_i32, %c0_i32_0 : i32, i32
  }
  func.func @transform_5(%arg0: i32) -> (i32, i32) {
    %c0_i32 = arith.constant 0 : i32
    %c0_i32_0 = arith.constant 0 : i32
    return %arg0, %c0_i32 : i32, i32
  }
}

</mosaic_0001>

<bundles_post_ra>
// kernel: tpu_custom_call.1
= control target key start
LH: loop header
LB: loop body
LE: loop exit
PB: predicated region body
PF: predicated region fallthrough
CT: control target
= control target key end

     0   :  { %11 = vsyncpa [#allocation4], 0  ;;  %s338_s0 = inlined_call_operand.hbm [shape: f32[8,128], index: 0, kind: input, shape index: {}]   ;;  %s339_s1 = inlined_call_operand.hbm [shape: f32[128,128], index: 1, kind: input, shape index: {}]   ;;  %s340_s2 = inlined_call_operand.vmem [shape: f32[1,128], index: 2, kind: input, shape index: {}]   ;;  %s341_s3 = inlined_call_operand.vmem [shape: f32[1,128], index: 3, kind: input, shape index: {}]   ;;  %s342_s4 = inlined_call_operand.<no memory space> [shape: f32[1,1], index: 4, kind: input, shape index: {}]   ;;  %s343_s5 = inlined_call_operand.vmem [shape: f32[8,1], index: 5, kind: output, shape index: {}]  }
   0x1   :  { %12 = vsyncpa [#allocation6], 0  ;;  %s284_s18 = smov [#allocation3]   ;;  %s285_s20 = smov [#allocation5]  }
   0x2   :  { %s19_s19 = sshll.u32 %s284_s18, 4  ;;  %s28_s21 = sshll.u32 %s285_s20, 4  ;;  %s20_s19 = int_to_ptr.vmem [resolvable:$true] %s19_s19  ;;  %s29_s21 = int_to_ptr.vmem [resolvable:$true] %s28_s21 }
   0x3   :  { %s248_s22 = scalar_lea.vmem %s20_s19, 128  ;;  %p253_p1 = scmp.lt.s32.totalorder %s20_s19, %s20_s19 }
   0x4   :  { %p249_p0 = scmp.ne.s32.totalorder %s20_s19, %s248_s22  ;;  %p254_p2 = scmp.lt.s32.totalorder %s248_s22, %s248_s22 }
   0x6   :  { %p255_p3 = por %p254_p2, %p253_p1 }
   0x8   :  { %p256_p4 = pnand %p255_p3, %p249_p0 }
   0xa   :  { %259 = shalt.err (!%p256_p4)
}
   0xb   :  { %22 = dma.hbm_to_vmem [thread:$0]  %s338_s0, 128, %s20_s19, [#allocation4]  }
   0xc   :  { %s268_s25 = scalar_lea.vmem %s29_s21, 2048  ;;  %p273_p6 = scmp.lt.s32.totalorder %s29_s21, %s29_s21 }
   0xd   :  { %p269_p5 = scmp.ne.s32.totalorder %s29_s21, %s268_s25  ;;  %p274_p7 = scmp.lt.s32.totalorder %s268_s25, %s268_s25 }
   0xf   :  { %p275_p8 = por %p274_p7, %p273_p6 }
  0x11   :  { %p276_p9 = pnand %p275_p8, %p269_p5 }
  0x13   :  { %279 = shalt.err (!%p276_p9)
}
  0x14   :  { %s286_s26 = smov 128   ;;  %s287_s27 = smov 8  }
  0x15   :  { %34 = dma.hbm_to_vmem [thread:$0]  %s339_s1, 2048, %s29_s21, [#allocation6], %s286_s26, %s286_s26, %s287_s27  }
  0x16   :  { %280 = dma.done.wait [#allocation4], 128  }
  0x17   :  { %281 = vsyncadd [#allocation4], 4294967168 }
  0x18   :  { %282 = dma.done.wait [#allocation6], 2048  }
  0x19   :  { %283 = vsyncadd [#allocation6], 4294965248  ;;  %v288_v0 = vmov 0.0   ;;  %vm289_vm0 = vmmov 0   ;;  %v63_v1 = vld [vmem:[#allocation5 + $0x78] sm:$0xff]  ;;  %v62_v2 = vld [vmem:[#allocation5 + $0x70] sm:$0xff]  ;;  %v160_v31 = vstv %s342_s4 }
  0x1a   :  { %193 = vmatprep.subr.mxu0 %v288_v0  ;;  %225 = vmatprep.mubr.msk.f32.mxu0 %vm289_vm0, %v288_v0  ;;  %v61_v3 = vld [vmem:[#allocation5 + $0x68] sm:$0xff]  ;;  %v60_v4 = vld [vmem:[#allocation5 + $0x60] sm:$0xff]  ;;  %v59_v5 = vld [vmem:[#allocation5 + $0x58] sm:$0xff]  ;;  %vm166_vm2 = vcmask 7168  }
  0x1b   :  { %194 = vmatpush3.msra.mxu0 %v63_v1  ;;  %v58_v6 = vld [vmem:[#allocation5 + $0x50] sm:$0xff]  ;;  %v57_v7 = vld [vmem:[#allocation5 + $0x48] sm:$0xff]  ;;  %v56_v8 = vld [vmem:[#allocation5 + $0x40] sm:$0xff] }
  0x1c   :  { %195 = vmatprep.subr.mxu0 %v288_v0  ;;  %v55_v9 = vld [vmem:[#allocation5 + $0x38] sm:$0xff]  ;;  %v54_v10 = vld [vmem:[#allocation5 + $0x30] sm:$0xff]  ;;  %v53_v11 = vld [vmem:[#allocation5 + $0x28] sm:$0xff] }
  0x1d   :  { %196 = vmatpush3.msra.mxu0 %v62_v2  ;;  %v52_v12 = vld [vmem:[#allocation5 + $0x20] sm:$0xff]  ;;  %v51_v13 = vld [vmem:[#allocation5 + $0x18] sm:$0xff]  ;;  %v50_v14 = vld [vmem:[#allocation5 + $0x10] sm:$0xff] }
  0x1e   :  { %197 = vmatprep.subr.mxu0 %v288_v0  ;;  %v49_v15 = vld [vmem:[#allocation5 + $0x8] sm:$0xff]  ;;  %v48_v16 = vld [vmem:[#allocation5] sm:$0xff]  ;;  %v47_v17 = vld [vmem:[#allocation3] sm:$0xff] }
  0x1f   :  { %198 = vmatpush3.msra.mxu0 %v61_v3  ;;  %v174_v18 = vld [vmem:[%s340_s2] ss:$0 sm:$0xff] }
  0x20   :  { %199 = vmatprep.subr.mxu0 %v288_v0  ;;  %v175_v28 = vld [vmem:[%s341_s3] ss:$0 sm:$0xff] }
  0x21   :  { %200 = vmatpush3.msra.mxu0 %v60_v4 }
  0x22   :  { %201 = vmatprep.subr.mxu0 %v288_v0 }
  0x23   :  { %202 = vmatpush3.msra.mxu0 %v59_v5 }
  0x24   :  { %203 = vmatprep.subr.mxu0 %v288_v0 }
  0x25   :  { %204 = vmatpush3.msra.mxu0 %v58_v6 }
  0x26   :  { %205 = vmatprep.subr.mxu0 %v288_v0 }
  0x27   :  { %206 = vmatpush3.msra.mxu0 %v57_v7 }
  0x28   :  { %207 = vmatprep.subr.mxu0 %v288_v0 }
  0x29   :  { %208 = vmatpush3.msra.mxu0 %v56_v8 }
  0x2a   :  { %209 = vmatprep.subr.mxu0 %v288_v0 }
  0x2b   :  { %210 = vmatpush3.msra.mxu0 %v55_v9 }
  0x2c   :  { %211 = vmatprep.subr.mxu0 %v288_v0 }
  0x2d   :  { %212 = vmatpush3.msra.mxu0 %v54_v10 }
  0x2e   :  { %213 = vmatprep.subr.mxu0 %v288_v0 }
  0x2f   :  { %214 = vmatpush3.msra.mxu0 %v53_v11 }
  0x30   :  { %215 = vmatprep.subr.mxu0 %v288_v0 }
  0x31   :  { %216 = vmatpush3.msra.mxu0 %v52_v12 }
  0x32   :  { %217 = vmatprep.subr.mxu0 %v288_v0 }
  0x33   :  { %218 = vmatpush3.msra.mxu0 %v51_v13 }
  0x34   :  { %219 = vmatprep.subr.mxu0 %v288_v0 }
  0x35   :  { %220 = vmatpush3.msra.mxu0 %v50_v14 }
  0x36   :  { %221 = vmatprep.subr.mxu0 %v288_v0 }
  0x37   :  { %222 = vmatpush3.msra.mxu0 %v49_v15 }
  0x38   :  { %223 = vmatprep.subr.mxu0 %v288_v0 }
  0x39   :  { %224 = vmatpush3.msra.mxu0 %v48_v16 }
  0x3a   :  { %226 = vmatmul.mubr.f32.vlgmr.msra.gmra.mxu0 %v47_v17 }
  0xfa   :  { %v137_v19 = vpop.f32.mrf.mxu0 }
  0xfb   :  { %v138_v20 = vadd.f32 %v174_v18, %v137_v19 }
  0xfc   :  { %v227_v21 = vpop.f32.mrf.mxu0 }
  0xfd   :  { %v141_v22 = vmul.f32 0.5, %v138_v20  ;;  %vm143_vm1 = vcmp.gt.f32.partialorder %v138_v20, 0.0 }
  0xff   :  { %234 = vtanh.f32 %v141_v22 }
 0x10c   :  { %v235_v23 = vpop.eup %234 }
 0x10d   :  { %v145_v24 = vsub.f32 1.0, %v235_v23  ;;  %v144_v25 = vmul.f32 2.0, %v235_v23 }
 0x10f   :  { %236 = vrcp.f32 %v145_v24 }
 0x11c   :  { %v237_v26 = vpop.eup %236 }
 0x11d   :  { %v147_v27 = vmul.f32 %v237_v26, %v144_v25 }
 0x11f   :  { %v148_v29 = vsel %vm143_vm1, %v138_v20, %v147_v27 }
 0x120   :  { %v156_v30 = vmul.f32 %v175_v28, %v148_v29 }
 0x122   :  { %157 = vadd.xlane.f32.xlu0 %v156_v30 }
 0x1ab   :  { %v158_v32 = vpop.xlane.xlu0 %157 }
 0x1ac   :  { %v161_v33 = vadd.f32 %v160_v31, %v158_v32 }
 0x1ae   :  { %v162_v34 = vmul.f32 0.5, %v161_v33 }
 0x1b0   :  { %238 = vtanh.f32 %v162_v34 }
 0x1bd   :  { %v239_v35 = vpop.eup %238 }
 0x1be   :  { %v164_v36 = vadd.f32 1.0, %v239_v35 }
 0x1c0   :  { %v165_v37 = vmul.f32 0.5, %v164_v36 }
 0x1c2   :  { %167 = vst.msk [vmem:[%s343_s5] sm:$0xff] %vm166_vm2, %v165_v37 }
 0x1c3   :  { %172 = vsyncpa [#allocation4], 1 }
 0x1c4   :  { %173 = vsyncpa [#allocation6], 1 }

</bundles_post_ra>
